<compile_context>
chip_gen: v6e
topology: v6e:2x2x1
jax: 0.10.0
libtpu: 0.0.40
codegen_flags: <defaults>
</compile_context>

<pallas_src>
import functools

import jax
import jax.numpy as jnp
from jax.experimental import pallas as pl
from jax.experimental.pallas import tpu as pltpu


def _cls_attn_kernel(x_ref, q_ref, wkv_ref, wo_ref, bo_ref, y_ref, attn_ref,
                     *, tb, n, dh, heads):
    # x_ref:    (TB, N, D)   batch tile of inputs
    # q_ref:    (H, Dh)      pre-scaled query (scale * cls_token @ Wq^T), batch-invariant
    # wkv_ref:  (D, 2*Dh)    fused [Wk^T | Wv^T]
    # wo_ref:   (Dh, Dm)     to_out weight (pre-transposed); bo_ref: (1, Dm)
    # y_ref:    (TB*H, Dm)   flat lane-dense output (reshaped to (B,H,Dm) in wrapper)
    # attn_ref: (TB, H, N)
    d = x_ref.shape[-1]

    # Single fused K/V projection: M = TB*N rows through the MXU.
    x_flat = x_ref[...].reshape(tb * n, d)                       # (TB*N, D)
    kv = jnp.dot(x_flat, wkv_ref[...],
                 preferred_element_type=jnp.float32)             # (TB*N, 2*Dh)
    kv = kv.reshape(tb, n, 2 * dh)
    k = kv[:, :, :dh]                                            # (TB, N, Dh)
    v = kv[:, :, dh:]                                            # (TB, N, Dh)

    # Batch-invariant, pre-scaled query broadcast over the batch tile.
    q = jnp.broadcast_to(q_ref[...], (tb, heads, dh))            # (TB, H, Dh)

    # dots: contraction over Dh; no materialized k^T (dot_general fuses the transpose).
    dots = jnp.einsum('bhd,bnd->bhn', q, k,
                      preferred_element_type=jnp.float32)        # (TB, H, N)

    # Numerically stable softmax over the last axis; reciprocal on the (idle) EUP.
    m = jnp.max(dots, axis=-1, keepdims=True)
    e = jnp.exp(dots - m)
    attn = e * pl.reciprocal(jnp.sum(e, axis=-1, keepdims=True), approx=True)

    out = jnp.einsum('bhn,bnd->bhd', attn.astype(v.dtype), v,
                     preferred_element_type=jnp.float32)         # (TB, H, Dh)

    # to_out Linear as one flat matmul: M = TB*H rows, lane-dense Dm output.
    out_flat = out.reshape(tb * heads, dh)
    y = jnp.dot(out_flat, wo_ref[...],
                preferred_element_type=jnp.float32) + bo_ref[...]

    y_ref[...] = y.astype(y_ref.dtype)
    attn_ref[...] = attn.astype(attn_ref.dtype)


def _pick_batch_tile(b, n, d, heads, dh, dm, *, budget_bytes=18 << 20):
    """Largest divisor of b whose per-tile f32 footprint (incl. pipeline double
    buffers and in-kernel intermediates) fits a conservative VMEM budget that is
    safe on v5e/v6e (128 MiB phys) and v7x (64 MiB phys / 32 MiB scoped)."""
    best = 1
    for tb in range(1, b + 1):
        if b % tb:
            continue
        # Flat y block (TB*H, Dm) needs sublane-aligned rows unless it spans all of B*H.
        if tb != b and (tb * heads) % 8:
            continue
        tile_bytes = 4 * (2 * tb * n * d             # x tile (double-buffered)
                          + 2 * tb * heads * dm      # y tile (double-buffered)
                          + 2 * tb * heads * n       # attn tile (double-buffered)
                          + 3 * tb * n * 2 * dh      # kv / k / v live values
                          + 2 * tb * heads * n       # dots / softmax temps
                          + tb * heads * dh)         # out
        if tile_bytes <= budget_bytes:
            best = tb
    return best


def cls_encoder_layer(x, params, *, dim, batch_tile=None):
    """x: (B, N, D) float32. params: dict of weights. Returns (y, attn)."""
    b, n, d = x.shape
    cls_tok = params["cls_token"]                        # (H, D)   (squeezed leading 1)
    heads = cls_tok.shape[0]
    scale = float(dim) ** (-0.5)

    # Hoist the batch-invariant query out of the kernel and fold in the softmax scale.
    q_scaled = (cls_tok @ params["wq"].T) * scale        # (H, Dh)
    dh = q_scaled.shape[1]

    # Fuse the K and V projections into one (D, 2*Dh) weight.
    w_kv = jnp.concatenate([params["wk"].T, params["wv"].T], axis=1)   # (D, 2*Dh)
    wo_t = params["wo"].T                                # (Dh, Dm)
    dm = wo_t.shape[1]
    bo = params["bo"].reshape(1, dm)

    tb = batch_tile if batch_tile is not None else _pick_batch_tile(b, n, d, heads, dh, dm)
    assert b % tb == 0, "batch must be divisible by the batch tile"
    grid = (b // tb,)

    kernel = functools.partial(_cls_attn_kernel, tb=tb, n=n, dh=dh, heads=heads)

    grid_spec = pltpu.PrefetchScalarGridSpec(
        num_scalar_prefetch=0,
        grid=grid,
        in_specs=[
            pl.BlockSpec((tb, n, d), lambda i: (i, 0, 0)),        # x (batch tile)
            pl.BlockSpec((heads, dh), lambda i: (0, 0)),          # q (pre-scaled)
            pl.BlockSpec((d, 2 * dh), lambda i: (0, 0)),          # [Wk^T | Wv^T]
            pl.BlockSpec((dh, dm), lambda i: (0, 0)),             # Wo^T
            pl.BlockSpec((1, dm), lambda i: (0, 0)),              # bo
        ],
        out_specs=[
            pl.BlockSpec((tb * heads, dm), lambda i: (i, 0)),     # y (flat slab)
            pl.BlockSpec((tb, heads, n), lambda i: (i, 0, 0)),    # attn
        ],
    )

    y_flat, attn = pl.pallas_call(
        kernel,
        grid_spec=grid_spec,
        out_shape=(
            jax.ShapeDtypeStruct((b * heads, dm), jnp.float32),
            jax.ShapeDtypeStruct((b, heads, n), jnp.float32),
        ),
        compiler_params=pltpu.CompilerParams(
            dimension_semantics=("parallel",),    # shards batch tiles across TCs on v7x
            vmem_limit_bytes=32 * 1024 * 1024,
        ),
    )(x, q_scaled, w_kv, wo_t, bo)

    return y_flat.reshape(b, heads, dm), attn


def cls_encoder_layer_ref(x, params, *, dim):
    """Pure-JAX reference mirroring the PyTorch forward."""
    cls_tok = params["cls_token"]                         # (H, D)
    scale = float(dim) ** (-0.5)
    q = cls_tok @ params["wq"].T                          # (H, Dh)
    k = jnp.einsum("bnd,ed->bne", x, params["wk"])        # (B, N, Dh)
    v = jnp.einsum("bnd,ed->bne", x, params["wv"])        # (B, N, Dh)
    dots = jnp.einsum("he,bne->bhn", q, k) * scale        # (B, H, N)
    attn = jax.nn.softmax(dots, axis=-1)
    out = jnp.einsum("bhn,bne->bhe", attn, v)             # (B, H, Dh)
    y = out @ params["wo"].T + params["bo"]               # (B, H, Dm)
    return y, attn


if __name__ == "__main__":
    # dim == dim_head is required by the module (to_q Linear is applied to the
    # dim_head-wide cls token). dim_mlp != dim_head exercises the to_out Linear.
    B, N = 32, 8
    DIM = 32          # dim == dim_head
    DIM_HEAD = 32
    DIM_MLP = 64
    HEADS = 8
    TB = 16           # batch tile: TB*N = 128 rows per K/V projection, grid = (2,)

    key = jax.random.PRNGKey(0)
    k_x, k_cls, k_q, k_k, k_v, k_o, k_b = jax.random.split(key, 7)

    x = jax.random.normal(k_x, (B, N, DIM), dtype=jnp.float32)

    params = {
        "cls_token": jax.random.normal(k_cls, (HEADS, DIM), dtype=jnp.float32),
        # nn.Linear weights are (out_features, in_features)
        "wq": jax.random.normal(k_q, (DIM_HEAD, DIM), dtype=jnp.float32) * 0.05,
        "wk": jax.random.normal(k_k, (DIM_HEAD, DIM), dtype=jnp.float32) * 0.05,
        "wv": jax.random.normal(k_v, (DIM_HEAD, DIM), dtype=jnp.float32) * 0.05,
        "wo": jax.random.normal(k_o, (DIM_MLP, DIM_HEAD), dtype=jnp.float32) * 0.05,
        "bo": jax.random.normal(k_b, (DIM_MLP,), dtype=jnp.float32) * 0.05,
    }

    y, attn = cls_encoder_layer(x, params, dim=DIM, batch_tile=TB)
    jax.block_until_ready((y, attn))

    y_ref, attn_ref = cls_encoder_layer_ref(x, params, dim=DIM)
    assert y.shape == (B, HEADS, DIM_MLP) and attn.shape == (B, HEADS, N)
    # Tolerances account for the approx (EUP) reciprocal in the softmax and the
    # scale being folded into q.
    assert jnp.allclose(y, y_ref, atol=2e-3, rtol=2e-3)
    assert jnp.allclose(attn, attn_ref, atol=2e-3, rtol=2e-3)

    print("KERNEL_OK")
</pallas_src>

<mosaic_0001>
module attributes {stable_mosaic.version = 11 : i64} {
  func.func @_cls_attn_kernel(%arg0: i32, %arg1: memref<16x8x32xf32, #tpu.memory_space<vmem>>, %arg2: memref<8x32xf32, #tpu.memory_space<vmem>>, %arg3: memref<32x64xf32, #tpu.memory_space<vmem>>, %arg4: memref<32x64xf32, #tpu.memory_space<vmem>>, %arg5: memref<1x64xf32, #tpu.memory_space<vmem>>, %arg6: memref<128x64xf32, #tpu.memory_space<vmem>>, %arg7: memref<16x8x8xf32, #tpu.memory_space<vmem>>) attributes {dimension_semantics = [#tpu.dimension_semantics<parallel>], iteration_bounds = array<i64: 2>, scalar_prefetch = 0 : i64, scratch_operands = 0 : i64, tpu.core_type = #tpu.core_type<tc>, window_params = [{transform_indices = @transform_0, window_bounds = array<i64: 16, 8, 32>}, {pipeline_mode = #tpu.pipeline_mode<synchronous>, transform_indices = @transform_1, window_bounds = array<i64: 8, 32>}, {pipeline_mode = #tpu.pipeline_mode<synchronous>, transform_indices = @transform_2, window_bounds = array<i64: 32, 64>}, {pipeline_mode = #tpu.pipeline_mode<synchronous>, transform_indices = @transform_3, window_bounds = array<i64: 32, 64>}, {pipeline_mode = #tpu.pipeline_mode<synchronous>, transform_indices = @transform_4, window_bounds = array<i64: 1, 64>}, {transform_indices = @transform_5, window_bounds = array<i64: 128, 64>}, {transform_indices = @transform_6, window_bounds = array<i64: 16, 8, 8>}]} {
    %c0 = arith.constant 0 : index
    %c0_0 = arith.constant 0 : index
    %c0_1 = arith.constant 0 : index
    %0 = vector.load %arg1[%c0, %c0_0, %c0_1] : memref<16x8x32xf32, #tpu.memory_space<vmem>>, vector<16x8x32xf32>
    %1 = vector.shape_cast %0 : vector<16x8x32xf32> to vector<128x32xf32>
    %c0_2 = arith.constant 0 : index
    %c0_3 = arith.constant 0 : index
    %2 = vector.load %arg3[%c0_2, %c0_3] : memref<32x64xf32, #tpu.memory_space<vmem>>, vector<32x64xf32>
    %cst = arith.constant dense<0.000000e+00> : vector<128x64xf32>
    %3 = tpu.matmul %1, %2, %cst {dimension_numbers = #tpu.dot_dimension_numbers<[1], [0], [0], [1], [0, 0, 1, 1], [], []>} : vector<128x32xf32>, vector<32x64xf32>, vector<128x64xf32> -> vector<128x64xf32>
    %4 = vector.shape_cast %3 : vector<128x64xf32> to vector<16x8x64xf32>
    %5 = vector.extract_strided_slice %4 {offsets = [0, 0, 0], sizes = [16, 8, 32], strides = [1, 1, 1]} : vector<16x8x64xf32> to vector<16x8x32xf32>
    %6 = vector.extract_strided_slice %4 {offsets = [0, 0, 32], sizes = [16, 8, 32], strides = [1, 1, 1]} : vector<16x8x64xf32> to vector<16x8x32xf32>
    %c0_4 = arith.constant 0 : index
    %c0_5 = arith.constant 0 : index
    %7 = vector.load %arg2[%c0_4, %c0_5] : memref<8x32xf32, #tpu.memory_space<vmem>>, vector<8x32xf32>
    %8 = vector.shape_cast %7 : vector<8x32xf32> to vector<1x8x32xf32>
    %9 = vector.broadcast %8 : vector<1x8x32xf32> to vector<16x8x32xf32>
    "tpu.trace_start"() <{level = 10 : i32, message = "bhd,bnd->bhn"}> : () -> ()
    %cst_6 = arith.constant dense<0.000000e+00> : vector<16x8x8xf32>
    %10 = tpu.matmul %9, %5, %cst_6 {dimension_numbers = #tpu.dot_dimension_numbers<[2], [2], [1], [1], [0, 0, 0, 1, 1, 1], [0], [0]>} : vector<16x8x32xf32>, vector<16x8x32xf32>, vector<16x8x8xf32> -> vector<16x8x8xf32>
    "tpu.trace_stop"() : () -> ()
    %cst_7 = arith.constant dense<0xFF800000> : vector<16x8xf32>
    %11 = vector.multi_reduction <maximumf>, %10, %cst_7 [2] : vector<16x8x8xf32> to vector<16x8xf32>
    %12 = vector.shape_cast %11 : vector<16x8xf32> to vector<16x8x1xf32>
    %13 = vector.broadcast %12 : vector<16x8x1xf32> to vector<16x8x8xf32>
    %14 = arith.subf %10, %13 : vector<16x8x8xf32>
    %15 = math.exp %14 : vector<16x8x8xf32>
    %cst_8 = arith.constant dense<0.000000e+00> : vector<16x8xf32>
    %16 = vector.multi_reduction <add>, %15, %cst_8 [2] : vector<16x8x8xf32> to vector<16x8xf32>
    %17 = vector.shape_cast %16 : vector<16x8xf32> to vector<16x8x1xf32>
    %18 = tpu.reciprocal %17 {approx = true} : vector<16x8x1xf32> -> vector<16x8x1xf32>
    %19 = vector.broadcast %18 : vector<16x8x1xf32> to vector<16x8x8xf32>
    %20 = arith.mulf %15, %19 : vector<16x8x8xf32>
    "tpu.trace_start"() <{level = 10 : i32, message = "bhn,bnd->bhd"}> : () -> ()
    %cst_9 = arith.constant dense<0.000000e+00> : vector<16x8x32xf32>
    %21 = tpu.matmul %20, %6, %cst_9 {dimension_numbers = #tpu.dot_dimension_numbers<[2], [1], [1], [2], [0, 0, 0, 1, 1, 2], [0], [0]>} : vector<16x8x8xf32>, vector<16x8x32xf32>, vector<16x8x32xf32> -> vector<16x8x32xf32>
    "tpu.trace_stop"() : () -> ()
    %22 = vector.shape_cast %21 : vector<16x8x32xf32> to vector<128x32xf32>
    %c0_10 = arith.constant 0 : index
    %c0_11 = arith.constant 0 : index
    %23 = vector.load %arg4[%c0_10, %c0_11] : memref<32x64xf32, #tpu.memory_space<vmem>>, vector<32x64xf32>
    %cst_12 = arith.constant dense<0.000000e+00> : vector<128x64xf32>
    %24 = tpu.matmul %22, %23, %cst_12 {dimension_numbers = #tpu.dot_dimension_numbers<[1], [0], [0], [1], [0, 0, 1, 1], [], []>} : vector<128x32xf32>, vector<32x64xf32>, vector<128x64xf32> -> vector<128x64xf32>
    %c0_13 = arith.constant 0 : index
    %c0_14 = arith.constant 0 : index
    %25 = vector.load %arg5[%c0_13, %c0_14] : memref<1x64xf32, #tpu.memory_space<vmem>>, vector<1x64xf32>
    %26 = vector.broadcast %25 : vector<1x64xf32> to vector<128x64xf32>
    %27 = arith.addf %24, %26 : vector<128x64xf32>
    %c0_15 = arith.constant 0 : index
    %c0_16 = arith.constant 0 : index
    %28 = vector.load %arg6[%c0_15, %c0_16] : memref<128x64xf32, #tpu.memory_space<vmem>>, vector<128x64xf32>
    tpu.vector_store %arg6[%c0_15, %c0_16], %27 {strides = array<i32>} : memref<128x64xf32, #tpu.memory_space<vmem>>, vector<128x64xf32>,
    %c0_17 = arith.constant 0 : index
    %c0_18 = arith.constant 0 : index
    %c0_19 = arith.constant 0 : index
    %29 = vector.load %arg7[%c0_17, %c0_18, %c0_19] : memref<16x8x8xf32, #tpu.memory_space<vmem>>, vector<16x8x8xf32>
    tpu.vector_store %arg7[%c0_17, %c0_18, %c0_19], %20 {strides = array<i32>} : memref<16x8x8xf32, #tpu.memory_space<vmem>>, vector<16x8x8xf32>,
    return
  }
  func.func @transform_0(%arg0: i32) -> (i32, i32, i32) {
    %c0_i32 = arith.constant 0 : i32
    %c0_i32_0 = arith.constant 0 : i32
    %c0_i32_1 = arith.constant 0 : i32
    return %arg0, %c0_i32, %c0_i32_0 : i32, i32, i32
  }
  func.func @transform_1(%arg0: i32) -> (i32, i32) {
    %c0_i32 = arith.constant 0 : i32
    %c0_i32_0 = arith.constant 0 : i32
    %c0_i32_1 = arith.constant 0 : i32
    return %c0_i32, %c0_i32_0 : i32, i32
  }
  func.func @transform_2(%arg0: i32) -> (i32, i32) {
    %c0_i32 = arith.constant 0 : i32
    %c0_i32_0 = arith.constant 0 : i32
    %c0_i32_1 = arith.constant 0 : i32
    return %c0_i32, %c0_i32_0 : i32, i32
  }
  func.func @transform_3(%arg0: i32) -> (i32, i32) {
    %c0_i32 = arith.constant 0 : i32
    %c0_i32_0 = arith.constant 0 : i32
    %c0_i32_1 = arith.constant 0 : i32
    return %c0_i32, %c0_i32_0 : i32, i32
  }
  func.func @transform_4(%arg0: i32) -> (i32, i32) {
    %c0_i32 = arith.constant 0 : i32
    %c0_i32_0 = arith.constant 0 : i32
    %c0_i32_1 = arith.constant 0 : i32
    return %c0_i32, %c0_i32_0 : i32, i32
  }
  func.func @transform_5(%arg0: i32) -> (i32, i32) {
    %c0_i32 = arith.constant 0 : i32
    %c0_i32_0 = arith.constant 0 : i32
    return %arg0, %c0_i32 : i32, i32
  }
  func.func @transform_6(%arg0: i32) -> (i32, i32, i32) {
    %c0_i32 = arith.constant 0 : i32
    %c0_i32_0 = arith.constant 0 : i32
    %c0_i32_1 = arith.constant 0 : i32
    return %arg0, %c0_i32, %c0_i32_0 : i32, i32, i32
  }
}

</mosaic_0001>

<bundles_post_ra>
// kernel: tpu_custom_call.1
= control target key start
LH: loop header
LB: loop body
LE: loop exit
PB: predicated region body
PF: predicated region fallthrough
CT: control target
= control target key end

     0   :  { %12 = vsyncpa [#allocation3], 0  ;;  %s4970_s0 = inlined_call_operand.hbm [shape: f32[32,8,32], index: 0, kind: input, shape index: {}]   ;;  %s4971_s1 = inlined_call_operand.hbm [shape: f32[8,32], index: 1, kind: input, shape index: {}]   ;;  %s4972_s2 = inlined_call_operand.hbm [shape: f32[32,64], index: 2, kind: input, shape index: {}]   ;;  %s4973_s3 = inlined_call_operand.hbm [shape: f32[32,64], index: 3, kind: input, shape index: {}]   ;;  %s4974_s4 = inlined_call_operand.vmem [shape: f32[1,64], index: 4, kind: input, shape index: {}]   ;;  %s4975_s5 = inlined_call_operand.vmem [shape: f32[256,64], index: 5, kind: output, shape index: {0}]   ;;  %s4976_s6 = inlined_call_operand.vmem [shape: f32[32,8,8], index: 6, kind: output, shape index: {1}]  }
   0x1   :  { %14 = vsyncpa [#allocation3 + $0x1], 0 }
   0x2   :  { %15 = vsyncpa [#allocation5], 0 }
   0x3   :  { %16 = vsyncpa [#allocation8], 0  ;;  %s4248_s21 = smov 0   ;;  %s4250_s22 = smov 0  }
   0x4   :  { %s4252_s23 = smov 0   ;;  %s4254_s24 = smov 0  }
   0x5 LB: > { %s3476_s25 = sadd.s32 4294967295, %s4202_s24   ;;  %p42_p0 = scmp.ne.s32.totalorder %s4194_s22, %s4190_s21  ;;  %s4202_s24 = sphi %s4254_s24, %s4992_s24   ;;  %s4198_s23 = sphi %s4252_s23, %s4991_s23   ;;  %s4194_s22 = sphi %s4250_s22, %s4990_s22   ;;  %s4190_s21 = sphi %s4248_s21, %s4989_s21  }
   0x6   : > { %p4270_p1 = scmp.eq.s32.totalorder %s3476_s25, 0  ;;  %p3478_p2 = scmp.ge.s32.totalorder %s4202_s24, 1 }
   0x7   : > { %p189_p3 = scmp.lt.s32.totalorder %s4202_s24, 3  ;;  %s4204_s29 = smov [#allocation4]  }
   0x8   : > { %s4981_s26 = scalar_select %p4270_p1, 1, 0 }
   0x9   : > { %p4278_p4 = por %p4270_p1, %p42_p0  ;;  %p4282_p5 = pnand %p3478_p2, %p189_p3 }
   0xa   : > { %s202_s30 = sshll.u32 %s4204_s29, 4  ;;  %s4205_s7 = smov [#allocation6]   ;;  %s203_s30 = int_to_ptr.vmem [resolvable:$true] %s202_s30 }
   0xb   : > { %s4982_s27 = scalar_select %p4278_p4, 1, 0 }
   0xc   : > { %s4983_s28 = scalar_select %p4282_p5, 1, 0 }
   0xd   : > { %p3929_p6 = pneg %p4282_p5  ;;  %s212_s8 = sshll.u32 %s4205_s7, 4  ;;  %s213_s8 = int_to_ptr.vmem [resolvable:$true] %s212_s8 }
   0xe   : > { %s4206_s10 = smov [#allocation7]   ;;  %s4065_s12 = scalar_lea.vmem %s203_s30, 128 }
   0xf   : > { %p4290_p7 = pnand %p3929_p6, %p4270_p1  ;;  %s225_s11 = sshll.u32 %s4206_s10, 4  ;;  %s226_s11 = int_to_ptr.vmem [resolvable:$true] %s225_s11 }
  0x10   : > { %p4066_p9 = scmp.ne.s32.totalorder %s203_s30, %s4065_s12  ;;  %p4073_p12 = scmp.lt.s32.totalorder %s203_s30, %s203_s30 }
  0x11   : > { %p4056_p8 = pneg %p4290_p7  ;;  %p4074_p13 = scmp.lt.s32.totalorder %s4065_s12, %s4065_s12 }
  0x13   : > { %p4068_p10 = pnand %p4066_p9, %p4056_p8  ;;  %p4075_p0 = por %p4074_p13, %p4073_p12 }
  0x15   : > { %p4069_p11 = pneg %p4068_p10 }
  0x17   : > { %p4076_p2 = pnand %p4075_p0, %p4069_p11 }
  0x19   : > { %4079 = shalt.err (!%p4076_p2)
}
  0x1a   : > { %3932 = dma.hbm_to_vmem [thread:$0]  (!%p4290_p7), %s4971_s1, 128, %s203_s30, [#allocation5]  }
  0x1b   : > { %s4091_s15 = scalar_lea.vmem %s213_s8, 512  ;;  %p4099_p9 = scmp.lt.s32.totalorder %s213_s8, %s213_s8 }
  0x1c   : > { %p4092_p3 = scmp.ne.s32.totalorder %s213_s8, %s4091_s15  ;;  %p4100_p10 = scmp.lt.s32.totalorder %s4091_s15, %s4091_s15 }
  0x1e   : > { %p4094_p6 = pnand %p4092_p3, %p4056_p8  ;;  %p4101_p4 = por %p4100_p10, %p4099_p9 }
  0x20   : > { %p4095_p1 = pneg %p4094_p6 }
  0x22   : > { %p4102_p5 = pnand %p4101_p4, %p4095_p1 }
  0x24   : > { %4105 = shalt.err (!%p4102_p5)
}
  0x25   : > { %s4207_s16 = smov 128   ;;  %s4208_s17 = smov 8  }
  0x26   : > { %3935 = dma.hbm_to_vmem [thread:$0]  (!%p4290_p7), %s4972_s2, 512, %s213_s8, [#allocation5], %s4207_s16, %s4207_s16, %s4208_s17  }
  0x27   : > { %s4117_s20 = scalar_lea.vmem %s226_s11, 512  ;;  %p4125_p4 = scmp.lt.s32.totalorder %s226_s11, %s226_s11 }
  0x28   : > { %p4118_p11 = scmp.ne.s32.totalorder %s226_s11, %s4117_s20  ;;  %p4126_p5 = scmp.lt.s32.totalorder %s4117_s20, %s4117_s20 }
  0x2a   : > { %p4120_p12 = pnand %p4118_p11, %p4056_p8  ;;  %p4127_p13 = por %p4126_p5, %p4125_p4 }
  0x2c   : > { %p4121_p1 = pneg %p4120_p12 }
  0x2e   : > { %p4128_p0 = pnand %p4127_p13, %p4121_p1 }
  0x30   : > { %4131 = shalt.err (!%p4128_p0)
}
  0x31   : > { %3938 = dma.hbm_to_vmem [thread:$0]  (!%p4290_p7), %s4973_s3, 512, %s226_s11, [#allocation8], %s4207_s16, %s4207_s16, %s4208_s17  }
  0x32   : > { %s4327_s30 = sadd.s32 1, %s4202_s24   ;;  %s29_s8 = sadd.s32 1, %s4198_s23 }
  0x33   : > { %s26_s7 = ssub.s32 %s4202_s24, %s4327_s30  ;;  %p36_p2 = scmp.ne.s32.totalorder %s4198_s23, %s4194_s22 }
  0x34   : > { %p27_p8 = scmp.eq.s32.totalorder %s26_s7, 0  ;;  %p37_p3 = scmp.eq.s32.totalorder %s4202_s24, 0 }
  0x35   : > { %p3946_p6 = scmp.lt.s32.totalorder %s4202_s24, 2  ;;  %s242_s10 = sand.u32 1, %s4198_s23  }
  0x36   : > { %s4337_s9 = scalar_select %p27_p8, %s4198_s23, %s29_s8  }
  0x37   : > { %p38_p9 = por %p37_p3, %p36_p2  ;;  %s3483_s12 = sshll.u32 %s242_s10, 7 }
  0x38   : > { %s3578_s13 = sshll.u32 %s4202_s24, 11  ;;  %s246_s11 = scalar_lea.vmem [#allocation2], %s3483_s12 }
  0x39   : > { %s4344_s18 = scalar_lea.hbm %s4970_s0, %s3578_s13  ;;  %s253_s19 = sshll.u32 %s246_s11, 4  ;;  %s4346_s19 = int_to_ptr.vmem [resolvable:$true] %s253_s19 }
  0x3a   : > { %p4348_p7 = pnand %p3946_p6, %p38_p9  ;;  %s4352_s21 = scalar_lea.sflag [#allocation3], %s242_s10 }
  0x3b   : > { %s4132_s29 = scalar_lea.hbm %s4344_s18, 2048  ;;  %s4137_s12 = scalar_lea.hbm %s4970_s0, 4096 }
  0x3c   : > { %p4133_p10 = scmp.ne.s32.totalorder %s4344_s18, %s4132_s29  ;;  %p4134_p11 = pneg %p4348_p7 }
  0x3d   : > { %p4138_p4 = scmp.lt.s32.totalorder %s4344_s18, %s4970_s0  ;;  %p4139_p5 = scmp.lt.s32.totalorder %s4137_s12, %s4132_s29 }
  0x3e   : > { %p4135_p12 = pnand %p4134_p11, %p4133_p10 }
  0x3f   : > { %p4140_p13 = por %p4139_p5, %p4138_p4 }
  0x40   : > { %p4136_p1 = pneg %p4135_p12 }
  0x42   : > { %p4141_p0 = pnand %p4140_p13, %p4136_p1 }
  0x44   : > { %4144 = shalt.err (!%p4141_p0)
}
  0x45   : > { %s4145_s10 = scalar_lea.vmem %s4346_s19, 2048  ;;  %s4209_s15 = smov [#allocation2]  }
  0x46   : > { %p4146_p8 = scmp.ne.s32.totalorder %s4346_s19, %s4145_s10  ;;  %s4150_s11 = sshll.u32 %s4209_s15, 4  ;;  %s4151_s11 = int_to_ptr.vmem [resolvable:$false] %s4150_s11 }
  0x47   : > { %s4152_s7 = scalar_lea.vmem %s4151_s11, 4096  ;;  %p4153_p6 = scmp.lt.s32.totalorder %s4346_s19, %s4151_s11 }
  0x48   : > { %p4148_p2 = pnand %p4146_p8, %p4134_p11  ;;  %p4154_p9 = scmp.lt.s32.totalorder %s4152_s7, %s4145_s10 }
  0x4a   : > { %p4149_p3 = pneg %p4148_p2  ;;  %p4155_p10 = por %p4154_p9, %p4153_p6 }
  0x4c   : > { %p4156_p12 = pnand %p4155_p10, %p4149_p3 }
  0x4e   : > { %4159 = shalt.err (!%p4156_p12)
}
  0x4f   : > { %3942 = dma.hbm_to_vmem [thread:$0]  (!%p4348_p7), %s4344_s18, 2048, %s4346_s19, %s4352_s21, %s4207_s16, %s4207_s16, %s4208_s17  }
  0x50   : > { %p4986_p11 = scmp.ne.s32.totalorder %s4983_s28, 0 }
  0x51   : > { %s267_s29 = sand.u32 (!%p4986_p11), 1, %s4194_s22   ;;  %p4987_p1 = scmp.ne.s32.totalorder (!%p4986_p11), %s4982_s27, 0 }
  0x52   : > { %265 = sbr.rel (%p4986_p11) target bundleno = 1318 (0x526), region = 40  ;;  %s3487_s8 = sshll.u32 (!%p4986_p11), %s267_s29, 7 }
  0x53   : > { %s268_s12 = scalar_lea.sflag (!%p4986_p11), [#allocation3], %s267_s29  ;;  %s4379_s13 = scalar_lea.vmem (!%p4986_p11), [#allocation2], %s3487_s8 }
  0x57   : > { %4177 = dma.done.wait (%p4987_p1), %s268_s12, 2048  }
  0x58   : > { %4179 = vsyncadd (%p4987_p1), %s268_s12, 4294965248  ;;  %p4988_p4 = scmp.ne.s32.totalorder %s4981_s26, 0 }
  0x5a   : > { %4181 = dma.done.wait (%p4988_p4), [#allocation5], 640  }
  0x5b   : > { %4183 = vsyncadd (%p4988_p4), [#allocation5], 4294966656 }
  0x5c   : > { %4185 = dma.done.wait (%p4988_p4), [#allocation8], 512  }
  0x5d   : > { %4187 = vsyncadd (%p4988_p4), [#allocation8], 4294966784  ;;  %vm350_vm0 = vcmask 261120   ;;  %v349_v0 = vld [vmem:[#allocation6 + $0x18] sm:$0xff]  ;;  %v348_v1 = vld [vmem:[#allocation6 + $0x10] sm:$0xff]  ;;  %v4210_v20 = vmov 0.0  }
  0x5e   : > { %3683 = vmatprep.subr.mxu0 %v349_v0  ;;  %v330_v2 = vld [vmem:[%s4379_s13] sm:$0xff]  ;;  %v347_v3 = vld [vmem:[#allocation6 + $0x8] sm:$0xff]  ;;  %v346_v4 = vld [vmem:[#allocation6] sm:$0xff]  ;;  %3715 = vmatprep.subr.mxu1 %v4210_v20  ;;  %vm4211_vm1 = vmmov 0   ;;  %vm1716_vm2 = vcmask 64512   ;;  %s4212_s26 = smov 96  }
  0x5f   : > { %3684 = vmatpush3.msra.mxu0 %v349_v0  ;;  %3691 = vmatprep.mubr.msk.f32.mxu0 %vm350_vm0, %v330_v2  ;;  %v331_v5 = vld [vmem:[%s4379_s13 + $0x8] sm:$0xff]  ;;  %v332_v6 = vld [vmem:[%s4379_s13 + $0x10] sm:$0xff]  ;;  %v333_v7 = vld [vmem:[%s4379_s13 + $0x18] sm:$0xff]  ;;  %s3491_s27 = sshll.u32 %s3476_s25, 4  ;;  %vm3313_vm3 = vcmask 523264  }
  0x60   : > { %3685 = vmatprep.subr.mxu0 %v348_v1  ;;  %v334_v8 = vld [vmem:[%s4379_s13 + $0x20] sm:$0xff]  ;;  %v335_v9 = vld [vmem:[%s4379_s13 + $0x28] sm:$0xff]  ;;  %v336_v10 = vld [vmem:[%s4379_s13 + $0x30] sm:$0xff]  ;;  %3717 = vmatprep.mubr.msk.f32.mxu1 %vm4211_vm1, %v4210_v20  ;;  %p319_p7 = scmp.lt.s32.totalorder %s3491_s27, 31 }
  0x61   : > { %3686 = vmatpush3.msra.mxu0 %v348_v1  ;;  %v337_v11 = vld [vmem:[%s4379_s13 + $0x38] sm:$0xff]  ;;  %v338_v12 = vld [vmem:[%s4379_s13 + $0x40] sm:$0xff]  ;;  %v339_v13 = vld [vmem:[%s4379_s13 + $0x48] sm:$0xff] }
  0x62   : > { %3687 = vmatprep.subr.mxu0 %v347_v3  ;;  %v340_v14 = vld [vmem:[%s4379_s13 + $0x50] sm:$0xff]  ;;  %v341_v15 = vld [vmem:[%s4379_s13 + $0x58] sm:$0xff]  ;;  %v342_v16 = vld [vmem:[%s4379_s13 + $0x60] sm:$0xff]  ;;  %s4994_s27 = smov (!%p319_p7, %s3491_s27), 31 }
  0x63   : > { %3688 = vmatpush3.msra.mxu0 %v347_v3  ;;  %v343_v17 = vld [vmem:[%s4379_s13 + $0x68] sm:$0xff]  ;;  %v344_v18 = vld [vmem:[%s4379_s13 + $0x70] sm:$0xff]  ;;  %v345_v19 = vld [vmem:[%s4379_s13 + $0x78] sm:$0xff]  ;;  %s3492_s24 = sshll.u32 %s4994_s27, 3 }
  0x64   : > { %3689 = vmatprep.subr.mxu0 %v346_v4  ;;  %v4437_v23 = vld [vmem:[#allocation4] sm:$0xff]  ;;  %s4781_s16 = scalar_lea.vmem %s4976_s6, %s3492_s24  ;;  %s4923_s21 = scalar_lea.vmem %s4975_s5, %s3492_s24 }
  0x65   : > { %3690 = vmatpush3.msra.mxu0 %v346_v4 }
  0x66   : > { %3692 = vmatmul.mubr.msk.f32.vlgmr.msra.gmra.mxu0 %vm350_vm0, %v331_v5  ;;  %3760 = vmatprep.subr.mxu0 %v4210_v20 }
  0x67   : > { %3694 = vmatprep.mubr.msk.f32.mxu0 %vm350_vm0, %v332_v6 }
  0x6a   : > { %3695 = vmatmul.mubr.msk.f32.gmra.mxu0 %vm350_vm0, %v333_v7 }
  0x6b   : > { %3697 = vmatprep.mubr.msk.f32.mxu0 %vm350_vm0, %v334_v8 }
  0x6e   : > { %3698 = vmatmul.mubr.msk.f32.gmra.mxu0 %vm350_vm0, %v335_v9 }
  0x6f   : > { %3700 = vmatprep.mubr.msk.f32.mxu0 %vm350_vm0, %v336_v10 }
  0x72   : > { %3701 = vmatmul.mubr.msk.f32.gmra.mxu0 %vm350_vm0, %v337_v11 }
  0x73   : > { %3703 = vmatprep.mubr.msk.f32.mxu0 %vm350_vm0, %v338_v12 }
  0x76   : > { %3704 = vmatmul.mubr.msk.f32.gmra.mxu0 %vm350_vm0, %v339_v13 }
  0x77   : > { %3706 = vmatprep.mubr.msk.f32.mxu0 %vm350_vm0, %v340_v14 }
  0x7a   : > { %3707 = vmatmul.mubr.msk.f32.gmra.mxu0 %vm350_vm0, %v341_v15 }
  0x7b   : > { %3709 = vmatprep.mubr.msk.f32.mxu0 %vm350_vm0, %v342_v16 }
  0x7e   : > { %3710 = vmatmul.mubr.msk.f32.gmra.mxu0 %vm350_vm0, %v343_v17 }
  0x7f   : > { %3712 = vmatprep.mubr.msk.f32.mxu0 %vm350_vm0, %v344_v18 }
  0x82   : > { %3713 = vmatmul.mubr.msk.f32.gmra.mxu0 %vm350_vm0, %v345_v19 }
  0x83   : > { %3762 = vmatprep.mubr.msk.f32.mxu0 %vm4211_vm1, %v4210_v20 }
 0x126   : > { %v4431_v21 = vpop.f32.mrf.mxu0 }
 0x128   : > { %v4433_v22 = vpop.f32.mrf.mxu0 }
 0x129   : > { %3716 = vmatpush3.xpose.msk.msra.mxu1 %vm350_vm0, %v4433_v22 }
 0x12a   : > { %v4439_v24 = vpop.f32.mrf.mxu0  ;;  %3720 = vmatprep.subr.mxu1 %v4210_v20 }
 0x12c   : > { %3718 = vmatmul.mubr.msk.f32.vlgmr.msra.gmra.mxu1 %vm350_vm0, %v4437_v23  ;;  %v4444_v25 = vpop.f32.mrf.mxu0 }
 0x12d   : > { %3721 = vmatpush3.xpose.msk.msra.mxu1 %vm350_vm0, %v4431_v21  ;;  %3722 = vmatprep.mubr.msk.f32.mxu1 %vm4211_vm1, %v4210_v20 }
 0x12e   : > { %v4450_v26 = vpop.f32.mrf.mxu0  ;;  %3725 = vmatprep.subr.mxu1 %v4210_v20 }
 0x130   : > { %3723 = vmatmul.mubr.msk.f32.vlgmr.msra.gmra.mxu1 %vm350_vm0, %v4437_v23  ;;  %v4455_v27 = vpop.f32.mrf.mxu0 }
 0x131   : > { %3726 = vmatpush3.xpose.msk.msra.mxu1 %vm350_vm0, %v4444_v25  ;;  %3727 = vmatprep.mubr.msk.f32.mxu1 %vm4211_vm1, %v4210_v20 }
 0x132   : > { %v4461_v28 = vpop.f32.mrf.mxu0  ;;  %3730 = vmatprep.subr.mxu1 %v4210_v20 }
 0x134   : > { %3728 = vmatmul.mubr.msk.f32.vlgmr.msra.gmra.mxu1 %vm350_vm0, %v4437_v23  ;;  %v4466_v29 = vpop.f32.mrf.mxu0 }
 0x135   : > { %3731 = vmatpush3.xpose.msk.msra.mxu1 %vm350_vm0, %v4439_v24  ;;  %3732 = vmatprep.mubr.msk.f32.mxu1 %vm4211_vm1, %v4210_v20 }
 0x136   : > { %v4472_v30 = vpop.f32.mrf.mxu0  ;;  %3735 = vmatprep.subr.mxu1 %v4210_v20 }
 0x137   : > { %3761 = vmatpush3.xpose.msk.msra.mxu0 %vm350_vm0, %v4472_v30 }
 0x138   : > { %3733 = vmatmul.mubr.msk.f32.vlgmr.msra.gmra.mxu1 %vm350_vm0, %v4437_v23  ;;  %v4479_v31 = vpop.f32.mrf.mxu0  ;;  %3770 = vmatprep.subr.mxu0 %v4210_v20 }
 0x139   : > { %3736 = vmatpush3.xpose.msk.msra.mxu1 %vm350_vm0, %v4455_v27  ;;  %3737 = vmatprep.mubr.msk.f32.mxu1 %vm4211_vm1, %v4210_v20 }
 0x13a   : > { %v4486_v32 = vpop.f32.mrf.mxu0  ;;  %3740 = vmatprep.subr.mxu1 %v4210_v20  ;;  %3763 = vmatmul.mubr.msk.f32.vlgmr.msra.gmra.mxu0 %vm350_vm0, %v4437_v23 }
 0x13b   : > { %3771 = vmatpush3.xpose.msk.msra.mxu0 %vm350_vm0, %v4486_v32  ;;  %3772 = vmatprep.mubr.msk.f32.mxu0 %vm4211_vm1, %v4210_v20 }
 0x13c   : > { %3738 = vmatmul.mubr.msk.f32.vlgmr.msra.gmra.mxu1 %vm350_vm0, %v4437_v23  ;;  %v4497_v33 = vpop.f32.mrf.mxu0  ;;  %3780 = vmatprep.subr.mxu0 %v4210_v20 }
 0x13d   : > { %3741 = vmatpush3.xpose.msk.msra.mxu1 %vm350_vm0, %v4450_v26  ;;  %3742 = vmatprep.mubr.msk.f32.mxu1 %vm4211_vm1, %v4210_v20 }
 0x13e   : > { %3745 = vmatprep.subr.mxu1 %v4210_v20  ;;  %3773 = vmatmul.mubr.msk.f32.vlgmr.msra.gmra.mxu0 %vm350_vm0, %v4437_v23  ;;  %v4507_v34 = vpop.f32.mrf.mxu0 }
 0x13f   : > { %3781 = vmatpush3.xpose.msk.msra.mxu0 %vm350_vm0, %v4507_v34  ;;  %3782 = vmatprep.mubr.msk.f32.mxu0 %vm4211_vm1, %v4210_v20 }
 0x140   : > { %3743 = vmatmul.mubr.msk.f32.vlgmr.msra.gmra.mxu1 %vm350_vm0, %v4437_v23  ;;  %v4515_v35 = vpop.f32.mrf.mxu0  ;;  %3790 = vmatprep.subr.mxu0 %v4210_v20 }
 0x141   : > { %3746 = vmatpush3.xpose.msk.msra.mxu1 %vm350_vm0, %v4466_v29  ;;  %3747 = vmatprep.mubr.msk.f32.mxu1 %vm4211_vm1, %v4210_v20 }
 0x142   : > { %3750 = vmatprep.subr.mxu1 %v4210_v20  ;;  %3783 = vmatmul.mubr.msk.f32.vlgmr.msra.gmra.mxu0 %vm350_vm0, %v4437_v23  ;;  %v4525_v36 = vpop.f32.mrf.mxu0 }
 0x143   : > { %3791 = vmatpush3.xpose.msk.msra.mxu0 %vm350_vm0, %v4525_v36  ;;  %3792 = vmatprep.mubr.msk.f32.mxu0 %vm4211_vm1, %v4210_v20 }
 0x144   : > { %3748 = vmatmul.mubr.msk.f32.vlgmr.msra.gmra.mxu1 %vm350_vm0, %v4437_v23  ;;  %3800 = vmatprep.subr.mxu0 %v4210_v20  ;;  %v4563_v37 = vpop.f32.mrf.mxu0 }
 0x145   : > { %3751 = vmatpush3.xpose.msk.msra.mxu1 %vm350_vm0, %v4461_v28  ;;  %3752 = vmatprep.mubr.msk.f32.mxu1 %vm4211_vm1, %v4210_v20 }
 0x146   : > { %3793 = vmatmul.mubr.msk.f32.vlgmr.msra.gmra.mxu0 %vm350_vm0, %v4437_v23  ;;  %3755 = vmatprep.subr.mxu1 %v4210_v20 }
 0x147   : > { %3802 = vmatprep.mubr.msk.f32.mxu0 %vm4211_vm1, %v4210_v20 }
 0x148   : > { %3753 = vmatmul.mubr.msk.f32.vlgmr.msra.gmra.mxu1 %vm350_vm0, %v4437_v23 }
 0x149   : > { %3756 = vmatpush3.xpose.msk.msra.mxu1 %vm350_vm0, %v4479_v31  ;;  %3757 = vmatprep.mubr.msk.f32.mxu1 %vm4211_vm1, %v4210_v20 }
 0x14a   : > { %3765 = vmatprep.subr.mxu1 %v4210_v20 }
 0x14c   : > { %3758 = vmatmul.mubr.msk.f32.vlgmr.msra.gmra.mxu1 %vm350_vm0, %v4437_v23 }
 0x14d   : > { %3766 = vmatpush3.xpose.msk.msra.mxu1 %vm350_vm0, %v4497_v33  ;;  %3767 = vmatprep.mubr.msk.f32.mxu1 %vm4211_vm1, %v4210_v20 }
 0x14e   : > { %3775 = vmatprep.subr.mxu1 %v4210_v20 }
 0x150   : > { %3768 = vmatmul.mubr.msk.f32.vlgmr.msra.gmra.mxu1 %vm350_vm0, %v4437_v23 }
 0x151   : > { %3776 = vmatpush3.xpose.msk.msra.mxu1 %vm350_vm0, %v4515_v35  ;;  %3777 = vmatprep.mubr.msk.f32.mxu1 %vm4211_vm1, %v4210_v20 }
 0x152   : > { %3785 = vmatprep.subr.mxu1 %v4210_v20 }
 0x154   : > { %3778 = vmatmul.mubr.msk.f32.vlgmr.msra.gmra.mxu1 %vm350_vm0, %v4437_v23 }
 0x155   : > { %3786 = vmatpush3.xpose.msk.msra.mxu1 %vm350_vm0, %v4563_v37  ;;  %3787 = vmatprep.mubr.msk.f32.mxu1 %vm4211_vm1, %v4210_v20 }
 0x156   : > { %3795 = vmatprep.subr.mxu1 %v4210_v20 }
 0x158   : > { %3788 = vmatmul.mubr.msk.f32.vlgmr.msra.gmra.mxu1 %vm350_vm0, %v4437_v23 }
 0x159   : > { %3797 = vmatprep.mubr.msk.f32.mxu1 %vm4211_vm1, %v4210_v20 }
 0x1ec   : > { %v4577_v38 = vpop.f32.mrf.mxu1 }
 0x1ed   : > { %v1717_v39 = vsel %vm1716_vm2, %v4577_v38, -inf }
 0x1ee   : > { %1718 = vmax.xlane.f32.xlu0 %v1717_v39  ;;  %v3719_v40 = vpop.f32.mrf.mxu1 }
 0x1f0   : > { %v4581_v41 = vpop.f32.mrf.mxu1 }
 0x1f1   : > { %v1720_v42 = vsel %vm1716_vm2, %v4581_v41, -inf }
 0x1f2   : > { %1721 = vmax.xlane.f32.xlu0 %v1720_v42  ;;  %v3724_v43 = vpop.f32.mrf.mxu1 }
 0x1f4   : > { %v4585_v44 = vpop.f32.mrf.mxu1 }
 0x1f5   : > { %v1723_v45 = vsel %vm1716_vm2, %v4585_v44, -inf }
 0x1f6   : > { %1724 = vmax.xlane.f32.xlu1 %v1723_v45  ;;  %v3729_v46 = vpop.f32.mrf.mxu1 }
 0x1f8   : > { %v4589_v47 = vpop.f32.mrf.mxu1 }
 0x1f9   : > { %v1726_v48 = vsel %vm1716_vm2, %v4589_v47, -inf }
 0x1fa   : > { %1727 = vmax.xlane.f32.xlu1 %v1726_v48  ;;  %v3734_v49 = vpop.f32.mrf.mxu1  ;;  %v4593_v50 = vpop.f32.mrf.mxu0 }
 0x1fb   : > { %v1744_v51 = vsel %vm1716_vm2, %v4593_v50, -inf }
 0x1fc   : > { %v4597_v52 = vpop.f32.mrf.mxu1  ;;  %v3764_v53 = vpop.f32.mrf.mxu0 }
 0x1fd   : > { %v1729_v54 = vsel %vm1716_vm2, %v4597_v52, -inf }
 0x1fe   : > { %1730 = vmax.xlane.f32.xlu0 %v1729_v54  ;;  %v3739_v55 = vpop.f32.mrf.mxu1  ;;  %1745 = vmax.xlane.f32.xlu1 %v1744_v51  ;;  %v4601_v56 = vpop.f32.mrf.mxu0 }
 0x1ff   : > { %v1750_v57 = vsel %vm1716_vm2, %v4601_v56, -inf }
 0x200   : > { %v4605_v58 = vpop.f32.mrf.mxu1  ;;  %v3774_v59 = vpop.f32.mrf.mxu0 }
 0x201   : > { %v1732_v1 = vsel %vm1716_vm2, %v4605_v58, -inf }
 0x202   : > { %v3744_v60 = vpop.f32.mrf.mxu1  ;;  %1751 = vmax.xlane.f32.xlu1 %v1750_v57  ;;  %v4607_v61 = vpop.f32.mrf.mxu0 }
 0x203   : > { %v1756_v4 = vsel %vm1716_vm2, %v4607_v61, -inf }
 0x204   : > { %v4609_v62 = vpop.f32.mrf.mxu1  ;;  %v3784_v63 = vpop.f32.mrf.mxu0 }
 0x205   : > { %v1735_v0 = vsel %vm1716_vm2, %v4609_v62, -inf }
 0x206   : > { %1736 = vmax.xlane.f32.xlu0 %v1735_v0  ;;  %v3749_v2 = vpop.f32.mrf.mxu1  ;;  %1733 = vmax.xlane.f32.xlu1 %v1732_v1  ;;  %v4615_v3 = vpop.f32.mrf.mxu0 }
 0x207   : > { %v1762_v11 = vsel %vm1716_vm2, %v4615_v3, -inf }
 0x208   : > { %v4619_v5 = vpop.f32.mrf.mxu1  ;;  %v3794_v6 = vpop.f32.mrf.mxu0 }
 0x209   : > { %v1738_v8 = vsel %vm1716_vm2, %v4619_v5, -inf }
 0x20a   : > { %1757 = vmax.xlane.f32.xlu1 %v1756_v4  ;;  %v3754_v7 = vpop.f32.mrf.mxu1 }
 0x20c   : > { %v4623_v9 = vpop.f32.mrf.mxu1 }
 0x20d   : > { %v1741_v18 = vsel %vm1716_vm2, %v4623_v9, -inf }
 0x20e   : > { %1739 = vmax.xlane.f32.xlu1 %v1738_v8  ;;  %v3759_v10 = vpop.f32.mrf.mxu1 }
 0x210   : > { %v4627_v12 = vpop.f32.mrf.mxu1 }
 0x211   : > { %v1747_v19 = vsel %vm1716_vm2, %v4627_v12, -inf }
 0x212   : > { %1763 = vmax.xlane.f32.xlu1 %v1762_v11  ;;  %v3769_v13 = vpop.f32.mrf.mxu1 }
 0x214   : > { %v4629_v14 = vpop.f32.mrf.mxu1 }
 0x216   : > { %v3779_v15 = vpop.f32.mrf.mxu1 }
 0x218   : > { %v4631_v16 = vpop.f32.mrf.mxu1 }
 0x21a   : > { %v3789_v17 = vpop.f32.mrf.mxu1 }
 0x21c   : > { %1893 = vrot.lane.b32.xlu0 %v4433_v22, %s4212_s26  ;;  %v1759_v22 = vsel %vm1716_vm2, %v4631_v16, -inf }
 0x220   : > { %2045 = vrot.lane.b32.xlu0 %v4444_v25, %s4212_s26 }
 0x223   : > { %1969 = vrot.lane.b32.xlu1 %v4431_v21, %s4212_s26  ;;  %v1753_v21 = vsel %vm1716_vm2, %v4629_v14, -inf }
 0x224   : > { %2121 = vrot.lane.b32.xlu0 %v4439_v24, %s4212_s26 }
 0x228   : > { %2197 = vrot.lane.b32.xlu0 %v4455_v27, %s4212_s26 }
 0x22c   : > { %2273 = vrot.lane.b32.xlu0 %v4450_v26, %s4212_s26 }
 0x230   : > { %2349 = vrot.lane.b32.xlu0 %v4466_v29, %s4212_s26 }
 0x234   : > { %2425 = vrot.lane.b32.xlu0 %v4461_v28, %s4212_s26 }
 0x238   : > { %2501 = vrot.lane.b32.xlu0 %v4479_v31, %s4212_s26 }
 0x23c   : > { %2577 = vrot.lane.b32.xlu0 %v4472_v30, %s4212_s26 }
 0x25b   : > { %1742 = vmax.xlane.f32.xlu0 %v1741_v18 }
 0x25f   : > { %1748 = vmax.xlane.f32.xlu0 %v1747_v19 }
 0x263   : > { %1754 = vmax.xlane.f32.xlu0 %v1753_v21 }
 0x267   : > { %1760 = vmax.xlane.f32.xlu0 %v1759_v22 }
 0x277   : > { %v1719_v23 = vpop.xlane.xlu0 %1718 }
 0x278   : > { %v1765_v28 = vsub.f32 %v4577_v38, %v1719_v23 }
 0x27a   : > { %v1781_v39 = vmul.f32 1.442695, %v1765_v28 }
 0x27b   : > { %v1722_v24 = vpop.xlane.xlu0 %1721 }
 0x27c   : > { %v1766_v25 = vsub.f32 %v4581_v41, %v1722_v24 }
 0x27d   : > { %2653 = vrot.lane.b32.xlu0 %v4497_v33, %s4212_s26 }
 0x27e   : > { %v1783_v26 = vmul.f32 1.442695, %v1766_v25 }
 0x27f   : > { %v1725_v27 = vpop.xlane.xlu1 %1724 }
 0x280   : > { %3990 = vpow2.f32 %v1783_v26  ;;  %v1767_v40 = vsub.f32 %v4585_v44, %v1725_v27 }
 0x282   : > { %v1785_v33 = vmul.f32 1.442695, %v1767_v40 }
 0x283   : > { %v1728_v29 = vpop.xlane.xlu1 %1727 }
 0x284   : > { %v1768_v30 = vsub.f32 %v4589_v47, %v1728_v29 }
 0x286   : > { %v1787_v31 = vmul.f32 1.442695, %v1768_v30 }
 0x287   : > { %v1746_v42 = vpop.xlane.xlu1 %1745  ;;  %v1731_v43 = vpop.xlane.xlu0 %1730 }
 0x288   : > { %3992 = vpow2.f32 %v1787_v31  ;;  %v1774_v41 = vsub.f32 %v4593_v50, %v1746_v42  ;;  %v1769_v46 = vsub.f32 %v4597_v52, %v1731_v43 }
 0x289   : > { %3994 = vpow2.f32 %v1781_v39 }
 0x28a   : > { %v1799_v45 = vmul.f32 1.442695, %v1774_v41  ;;  %v1789_v51 = vmul.f32 1.442695, %v1769_v46 }
 0x28b   : > { %v1752_v48 = vpop.xlane.xlu1 %1751 }
 0x28c   : > { %v1776_v38 = vsub.f32 %v4601_v56, %v1752_v48  ;;  %3996 = vpow2.f32 %v1799_v45 }
 0x28d   : > { %v4670_v49 = vpop.eup %3990  ;;  %3998 = vpow2.f32 %v1785_v33 }
 0x28e   : > { %v1803_v47 = vmul.f32 1.442695, %v1776_v38  ;;  %v1816_v44 = vsel %vm1716_vm2, %v4670_v49, 0.0 }
 0x28f   : > { %v1737_v53 = vpop.xlane.xlu0 %1736  ;;  %v1734_v54 = vpop.xlane.xlu1 %1733  ;;  %1817 = vadd.xlane.f32.xlu1 %v1816_v44 }
 0x290   : > { %4000 = vpow2.f32 %v1803_v47  ;;  %v1771_v50 = vsub.f32 %v4609_v62, %v1737_v53  ;;  %v1770_v52 = vsub.f32 %v4605_v58, %v1734_v54 }
 0x291   : > { %4002 = vpow2.f32 %v1789_v51 }
 0x292   : > { %v1791_v55 = vmul.f32 1.442695, %v1770_v52  ;;  %v1793_v56 = vmul.f32 1.442695, %v1771_v50 }
 0x293   : > { %v1894_v57 = vpop.permute.xlu0 %1893  ;;  %v1758_v59 = vpop.xlane.xlu1 %1757 }
 0x294   : > { %v1778_v60 = vsub.f32 %v4607_v61, %v1758_v59  ;;  %3796 = vmatpush3.msra.mxu1 %v1894_v57  ;;  %4004 = vpow2.f32 %v1791_v55 }
 0x295   : > { %v4677_v63 = vpop.eup %3992  ;;  %3805 = vmatprep.subr.mxu1 %v4210_v20  ;;  %4006 = vpow2.f32 %v1793_v56 }
 0x296   : > { %v1807_v0 = vmul.f32 1.442695, %v1778_v60  ;;  %v1822_v1 = vsel %vm1716_vm2, %v4677_v63, 0.0  ;;  %v4682_v58 = vpop.eup %3994 }
 0x297   : > { %v1740_v62 = vpop.xlane.xlu1 %1739  ;;  %1823 = vadd.xlane.f32.xlu1 %v1822_v1  ;;  %v1813_v7 = vsel %vm1716_vm2, %v4682_v58, 0.0  ;;  %v4725_v31 = vpop.permute.xlu0 %2045 }
 0x298   : > { %4008 = vpow2.f32 %v1807_v0  ;;  %v1772_v61 = vsub.f32 %v4619_v5, %v1740_v62 }
 0x299   : > { %v4684_v2 = vpop.eup %3996 }
 0x29a   : > { %v1840_v4 = vsel %vm1716_vm2, %v4684_v2, 0.0  ;;  %v4691_v8 = vpop.eup %3998  ;;  %v1795_v13 = vmul.f32 1.442695, %v1772_v61 }
 0x29b   : > { %v1764_v6 = vpop.xlane.xlu1 %1763  ;;  %1841 = vadd.xlane.f32.xlu1 %v1840_v4  ;;  %v1819_v18 = vsel %vm1716_vm2, %v4691_v8, 0.0  ;;  %v2122_v39 = vpop.permute.xlu0 %2121 }
 0x29c   : > { %v1780_v10 = vsub.f32 %v4615_v3, %v1764_v6  ;;  %1814 = vadd.xlane.f32.xlu0 %v1813_v7 }
 0x29d   : > { %v4694_v11 = vpop.eup %4000 }
 0x29e   : > { %v1811_v15 = vmul.f32 1.442695, %v1780_v10  ;;  %v1846_v5 = vsel %vm1716_vm2, %v4694_v11, 0.0  ;;  %v4700_v19 = vpop.eup %4002 }
 0x29f   : > { %v1970_v17 = vpop.permute.xlu1 %1969  ;;  %1847 = vadd.xlane.f32.xlu1 %v1846_v5  ;;  %v1825_v22 = vsel %vm1716_vm2, %v4700_v19, 0.0  ;;  %v4727_v40 = vpop.permute.xlu0 %2197 }
 0x2a0   : > { %4010 = vpow2.f32 %v1811_v15  ;;  %1820 = vadd.xlane.f32.xlu0 %v1819_v18  ;;  %3801 = vmatpush3.msra.mxu0 %v1970_v17 }
 0x2a1   : > { %v4702_v21 = vpop.eup %4004  ;;  %4012 = vpow2.f32 %v1795_v13  ;;  %3810 = vmatprep.subr.mxu0 %v4210_v20 }
 0x2a2   : > { %v1828_v3 = vsel %vm1716_vm2, %v4702_v21, 0.0  ;;  %v4709_v23 = vpop.eup %4006 }
 0x2a3   : > { %1829 = vadd.xlane.f32.xlu1 %v1828_v3  ;;  %v1831_v26 = vsel %vm1716_vm2, %v4709_v23, 0.0  ;;  %v4729_v42 = vpop.permute.xlu0 %2273 }
 0x2a4   : > { %1826 = vadd.xlane.f32.xlu0 %v1825_v22 }
 0x2a5   : > { %v4711_v24 = vpop.eup %4008 }
 0x2a6   : > { %v1852_v25 = vsel %vm1716_vm2, %v4711_v24, 0.0 }
 0x2a7   : > { %1853 = vadd.xlane.f32.xlu1 %v1852_v25  ;;  %v4731_v43 = vpop.permute.xlu0 %2349 }
 0x2a8   : > { %1832 = vadd.xlane.f32.xlu0 %v1831_v26 }
 0x2ab   : > { %v4733_v41 = vpop.permute.xlu0 %2425 }
 0x2ad   : > { %v4717_v27 = vpop.eup %4010 }
 0x2ae   : > { %v1858_v28 = vsel %vm1716_vm2, %v4717_v27, 0.0  ;;  %v4721_v29 = vpop.eup %4012 }
 0x2af   : > { %1859 = vadd.xlane.f32.xlu1 %v1858_v28  ;;  %v1834_v30 = vsel %vm1716_vm2, %v4721_v29, 0.0  ;;  %v4735_v45 = vpop.permute.xlu0 %2501 }
 0x2b3   : > { %1835 = vadd.xlane.f32.xlu1 %v1834_v30  ;;  %v4737_v33 = vpop.permute.xlu0 %2577 }
 0x2e4   : > { %v1743_v46 = vpop.xlane.xlu0 %1742 }
 0x2e5   : > { %v1773_v48 = vsub.f32 %v4623_v9, %v1743_v46 }
 0x2e7   : > { %v1797_v38 = vmul.f32 1.442695, %v1773_v48 }
 0x2e8   : > { %v1749_v47 = vpop.xlane.xlu0 %1748 }
 0x2e9   : > { %4014 = vpow2.f32 %v1797_v38  ;;  %v1775_v44 = vsub.f32 %v4627_v12, %v1749_v47 }
 0x2eb   : > { %v1801_v51 = vmul.f32 1.442695, %v1775_v44 }
 0x2ec   : > { %v1755_v53 = vpop.xlane.xlu0 %1754 }
 0x2ed   : > { %4016 = vpow2.f32 %v1801_v51  ;;  %v1777_v54 = vsub.f32 %v4629_v14, %v1755_v53 }
 0x2ef   : > { %v1805_v50 = vmul.f32 1.442695, %v1777_v54 }
 0x2f0   : > { %v1761_v52 = vpop.xlane.xlu0 %1760 }
 0x2f1   : > { %4018 = vpow2.f32 %v1805_v50  ;;  %v1779_v55 = vsub.f32 %v4631_v16, %v1761_v52  ;;  %v3112_v52 = vld [vmem:[#allocation7 + $0x18] sm:$0xff] }
 0x2f3   : > { %v1809_v56 = vmul.f32 1.442695, %v1779_v55 }
 0x2f5   : > { %4020 = vpow2.f32 %v1809_v56  ;;  %v3111_v56 = vld [vmem:[#allocation7 + $0x10] sm:$0xff] }
 0x2f6   : > { %v4743_v57 = vpop.eup %4014 }
 0x2f7   : > { %v1837_v9 = vsel %vm1716_vm2, %v4743_v57, 0.0 }
 0x2f8   : > { %1838 = vadd.xlane.f32.xlu0 %v1837_v9  ;;  %v3110_v9 = vld [vmem:[#allocation7 + $0x8] sm:$0xff] }
 0x2fa   : > { %v4747_v12 = vpop.eup %4016 }
 0x2fb   : > { %v1843_v59 = vsel %vm1716_vm2, %v4747_v12, 0.0 }
 0x2fc   : > { %1844 = vadd.xlane.f32.xlu0 %v1843_v59 }
 0x2fe   : > { %v4751_v14 = vpop.eup %4018 }
 0x2ff   : > { %v1849_v16 = vsel %vm1716_vm2, %v4751_v14, 0.0 }
 0x300   : > { %1850 = vadd.xlane.f32.xlu0 %v1849_v16 }
 0x302   : > { %v4755_v60 = vpop.eup %4020 }
 0x303   : > { %v1855_v0 = vsel %vm1716_vm2, %v4755_v60, 0.0 }
 0x304   : > { %1856 = vadd.xlane.f32.xlu1 %v1855_v0 }
 0x315   : > { %2729 = vrot.lane.b32.xlu1 %v4486_v32, %s4212_s26  ;;  %v4771_v32 = vpop.permute.xlu0 %2653 }
 0x316   : > { %2805 = vrot.lane.b32.xlu0 %v4515_v35, %s4212_s26 }
 0x318   : > { %v1818_v1 = vpop.xlane.xlu1 %1817 }
 0x319   : > { %4022 = vrcp.f32 %v1818_v1 }
 0x31a   : > { %2881 = vrot.lane.b32.xlu0 %v4507_v34, %s4212_s26 }
 0x31e   : > { %2957 = vrot.lane.b32.xlu0 %v4563_v37, %s4212_s26 }
 0x320   : > { %v1824_v62 = vpop.xlane.xlu1 %1823 }
 0x321   : > { %4024 = vrcp.f32 %v1824_v62 }
 0x322   : > { %3033 = vrot.lane.b32.xlu0 %v4525_v36, %s4212_s26 }
 0x324   : > { %v1842_v35 = vpop.xlane.xlu1 %1841 }
 0x325   : > { %v1815_v61 = vpop.xlane.xlu0 %1814  ;;  %4026 = vrcp.f32 %v1842_v35 }
 0x326   : > { %v4023_v4 = vpop.eup %4022  ;;  %4028 = vrcp.f32 %v1815_v61 }
 0x327   : > { %v1878_v34 = vmul.f32 %v4023_v4, %v4670_v49 }
 0x328   : > { %v1848_v37 = vpop.xlane.xlu1 %1847 }
 0x329   : > { %v1821_v6 = vpop.xlane.xlu0 %1820  ;;  %3803 = vmatmul.mubr.msk.f32.vlgmr.msra.gmra.mxu0 %vm1716_vm2, %v1878_v34  ;;  %3331 = vst.msk [vmem:[%s4781_s16 + $0x8] sm:$0xff] %vm1716_vm2, %v1878_v34  ;;  %4030 = vrcp.f32 %v1848_v37 }
 0x32a   : > { %3811 = vmatpush3.msra.mxu0 %v2122_v39  ;;  %3812 = vmatprep.mubr.msk.f32.mxu0 %vm4211_vm1, %v4210_v20  ;;  %4032 = vrcp.f32 %v1821_v6 }
 0x32b   : > { %3820 = vmatprep.subr.mxu0 %v4210_v20 }
 0x32c   : > { %v1830_v36 = vpop.xlane.xlu1 %1829 }
 0x32d   : > { %v1827_v7 = vpop.xlane.xlu0 %1826  ;;  %4034 = vrcp.f32 %v1830_v36 }
 0x32e   : > { %v4025_v10 = vpop.eup %4024  ;;  %4036 = vrcp.f32 %v1827_v7 }
 0x32f   : > { %v1880_v49 = vmul.f32 %v4025_v10, %v4677_v63 }
 0x330   : > { %v1854_v13 = vpop.xlane.xlu1 %1853 }
 0x331   : > { %v1833_v15 = vpop.xlane.xlu0 %1832  ;;  %3813 = vmatmul.mubr.msk.f32.vlgmr.msra.gmra.mxu0 %vm1716_vm2, %v1880_v49  ;;  %3333 = vst.msk [vmem:[%s4781_s16 + $0x18] sm:$0xff] %vm1716_vm2, %v1880_v49  ;;  %4038 = vrcp.f32 %v1854_v13 }
 0x332   : > { %3821 = vmatpush3.msra.mxu0 %v4729_v42  ;;  %3822 = vmatprep.mubr.msk.f32.mxu0 %vm4211_vm1, %v4210_v20  ;;  %v4027_v5 = vpop.eup %4026  ;;  %4040 = vrcp.f32 %v1833_v15 }
 0x333   : > { %3830 = vmatprep.subr.mxu0 %v4210_v20  ;;  %v4029_v17 = vpop.eup %4028  ;;  %v1886_v63 = vmul.f32 %v4027_v5, %v4684_v2 }
 0x334   : > { %v1877_v18 = vmul.f32 %v4029_v17, %v4682_v58 }
 0x335   : > { %3339 = vst.msk [vmem:[%s4781_s16 + $0x48] sm:$0xff] %vm1716_vm2, %v1886_v63 }
 0x336   : > { %v4031_v3 = vpop.eup %4030  ;;  %3798 = vmatmul.mubr.msk.f32.vlgmr.msra.gmra.mxu1 %vm1716_vm2, %v1877_v18  ;;  %3330 = vst.msk [vmem:[%s4781_s16] sm:$0xff] %vm1716_vm2, %v1877_v18 }
 0x337   : > { %v4033_v22 = vpop.eup %4032  ;;  %3806 = vmatpush3.msra.mxu1 %v4725_v31  ;;  %3807 = vmatprep.mubr.msk.f32.mxu1 %vm4211_vm1, %v4210_v20  ;;  %v4809_v26 = vmul.f32 %v4031_v3, %v4694_v11 }
 0x338   : > { %v1860_v25 = vpop.xlane.xlu1 %1859  ;;  %3815 = vmatprep.subr.mxu1 %v4210_v20  ;;  %v1879_v58 = vmul.f32 %v4033_v22, %v4691_v8 }
 0x339   : > { %4042 = vrcp.f32 %v1860_v25  ;;  %3341 = vst.msk [vmem:[%s4781_s16 + $0x58] sm:$0xff] %vm1716_vm2, %v4809_v26 }
 0x33a   : > { %v4035_v2 = vpop.eup %4034  ;;  %3808 = vmatmul.mubr.msk.f32.vlgmr.msra.gmra.mxu1 %vm1716_vm2, %v1879_v58  ;;  %3332 = vst.msk [vmem:[%s4781_s16 + $0x10] sm:$0xff] %vm1716_vm2, %v1879_v58 }
 0x33b   : > { %v4037_v28 = vpop.eup %4036  ;;  %3816 = vmatpush3.msra.mxu1 %v4727_v40  ;;  %3817 = vmatprep.mubr.msk.f32.mxu1 %vm4211_vm1, %v4210_v20  ;;  %v1882_v30 = vmul.f32 %v4035_v2, %v4702_v21 }
 0x33c   : > { %v1836_v11 = vpop.xlane.xlu1 %1835  ;;  %3825 = vmatprep.subr.mxu1 %v4210_v20  ;;  %v1881_v8 = vmul.f32 %v4037_v28, %v4700_v19 }
 0x33d   : > { %4044 = vrcp.f32 %v1836_v11  ;;  %3823 = vmatmul.mubr.msk.f32.vlgmr.msra.gmra.mxu0 %vm1716_vm2, %v1882_v30  ;;  %3335 = vst.msk [vmem:[%s4781_s16 + $0x28] sm:$0xff] %vm1716_vm2, %v1882_v30  ;;  %v3559_v11 = vld [vmem:[%s4974_s4] ss:$0 sm:$0xff] }
 0x33e   : > { %v4039_v31 = vpop.eup %4038  ;;  %3831 = vmatpush3.msra.mxu0 %v4733_v41  ;;  %3818 = vmatmul.mubr.msk.f32.vlgmr.msra.gmra.mxu1 %vm1716_vm2, %v1881_v8  ;;  %3334 = vst.msk [vmem:[%s4781_s16 + $0x20] sm:$0xff] %vm1716_vm2, %v1881_v8 }
 0x33f   : > { %v4041_v39 = vpop.eup %4040  ;;  %3826 = vmatpush3.msra.mxu1 %v4731_v43  ;;  %3827 = vmatprep.mubr.msk.f32.mxu1 %vm4211_vm1, %v4210_v20  ;;  %v1890_v19 = vmul.f32 %v4039_v31, %v4711_v24 }
 0x340   : > { %3835 = vmatprep.subr.mxu1 %v4210_v20  ;;  %v1883_v21 = vmul.f32 %v4041_v39, %v4709_v23  ;;  %3832 = vmatprep.mubr.msk.f32.mxu0 %vm4211_vm1, %v4210_v20 }
 0x341   : > { %3840 = vmatprep.subr.mxu0 %v4210_v20  ;;  %3343 = vst.msk [vmem:[%s4781_s16 + $0x68] sm:$0xff] %vm1716_vm2, %v1890_v19 }
 0x342   : > { %3828 = vmatmul.mubr.msk.f32.vlgmr.msra.gmra.mxu1 %vm1716_vm2, %v1883_v21  ;;  %3336 = vst.msk [vmem:[%s4781_s16 + $0x30] sm:$0xff] %vm1716_vm2, %v1883_v21 }
 0x343   : > { %3836 = vmatpush3.msra.mxu1 %v4735_v45  ;;  %3837 = vmatprep.mubr.msk.f32.mxu1 %vm4211_vm1, %v4210_v20 }
 0x344   : > { %3845 = vmatprep.subr.mxu1 %v4210_v20 }
 0x346   : > { %v4043_v24 = vpop.eup %4042 }
 0x347   : > { %v1892_v23 = vmul.f32 %v4043_v24, %v4717_v27 }
 0x349   : > { %3345 = vst.msk [vmem:[%s4781_s16 + $0x78] sm:$0xff] %vm1716_vm2, %v1892_v23 }
 0x34a   : > { %v4045_v40 = vpop.eup %4044 }
 0x34b   : > { %v1884_v42 = vmul.f32 %v4045_v40, %v4721_v29 }
 0x34d   : > { %3833 = vmatmul.mubr.msk.f32.vlgmr.msra.gmra.mxu0 %vm1716_vm2, %v1884_v42  ;;  %3337 = vst.msk [vmem:[%s4781_s16 + $0x38] sm:$0xff] %vm1716_vm2, %v1884_v42 }
 0x34e   : > { %3841 = vmatpush3.msra.mxu0 %v4737_v33  ;;  %3842 = vmatprep.mubr.msk.f32.mxu0 %vm4211_vm1, %v4210_v20 }
 0x34f   : > { %3850 = vmatprep.subr.mxu0 %v4210_v20 }
 0x351   : > { %3843 = vmatmul.mubr.msk.f32.vlgmr.msra.gmra.mxu0 %vm1716_vm2, %v1886_v63 }
 0x352   : > { %3852 = vmatprep.mubr.msk.f32.mxu0 %vm4211_vm1, %v4210_v20 }
 0x381   : > { %v1839_v27 = vpop.xlane.xlu0 %1838 }
 0x382   : > { %4046 = vrcp.f32 %v1839_v27 }
 0x385   : > { %v1845_v29 = vpop.xlane.xlu0 %1844 }
 0x386   : > { %4048 = vrcp.f32 %v1845_v29 }
 0x389   : > { %v1851_v43 = vpop.xlane.xlu0 %1850 }
 0x38a   : > { %4050 = vrcp.f32 %v1851_v43 }
 0x38d   : > { %v2806_v41 = vpop.permute.xlu0 %2805  ;;  %v1857_v45 = vpop.xlane.xlu1 %1856 }
 0x38e   : > { %4052 = vrcp.f32 %v1857_v45 }
 0x38f   : > { %v4047_v33 = vpop.eup %4046 }
 0x390   : > { %v1885_v46 = vmul.f32 %v4047_v33, %v4743_v57 }
 0x391   : > { %v2882_v48 = vpop.permute.xlu0 %2881  ;;  %v2730_v38 = vpop.permute.xlu1 %2729 }
 0x392   : > { %3838 = vmatmul.mubr.msk.f32.vlgmr.msra.gmra.mxu1 %vm1716_vm2, %v1885_v46  ;;  %3338 = vst.msk [vmem:[%s4781_s16 + $0x40] sm:$0xff] %vm1716_vm2, %v1885_v46  ;;  %3851 = vmatpush3.msra.mxu0 %v2730_v38 }
 0x393   : > { %v4049_v47 = vpop.eup %4048  ;;  %3846 = vmatpush3.msra.mxu1 %v4771_v32  ;;  %3853 = vmatmul.mubr.msk.f32.vlgmr.msra.gmra.mxu0 %vm1716_vm2, %v4809_v26 }
 0x394   : > { %3860 = vmatprep.subr.mxu0 %v4210_v20  ;;  %3847 = vmatprep.mubr.msk.f32.mxu1 %vm4211_vm1, %v4210_v20  ;;  %v1887_v44 = vmul.f32 %v4049_v47, %v4747_v12  ;;  %v3109_v12 = vld [vmem:[#allocation7] sm:$0xff] }
 0x395   : > { %3861 = vmatpush3.msra.mxu0 %v2882_v48  ;;  %3855 = vmatprep.subr.mxu1 %v4210_v20  ;;  %v2958_v51 = vpop.permute.xlu0 %2957 }
 0x396   : > { %3848 = vmatmul.mubr.msk.f32.vlgmr.msra.gmra.mxu1 %vm1716_vm2, %v1887_v44  ;;  %3340 = vst.msk [vmem:[%s4781_s16 + $0x50] sm:$0xff] %vm1716_vm2, %v1887_v44  ;;  %3862 = vmatprep.mubr.msk.f32.mxu0 %vm4211_vm1, %v4210_v20 }
 0x397   : > { %v4051_v53 = vpop.eup %4050  ;;  %3856 = vmatpush3.msra.mxu1 %v2806_v41  ;;  %3863 = vmatmul.mubr.msk.f32.vlgmr.msra.gmra.mxu0 %vm1716_vm2, %v1890_v19 }
 0x398   : > { %3857 = vmatprep.mubr.msk.f32.mxu1 %vm4211_vm1, %v4210_v20  ;;  %3865 = vmatprep.subr.mxu1 %v4210_v20  ;;  %v1889_v54 = vmul.f32 %v4051_v53, %v4751_v14 }
 0x399   : > { %v3034_v50 = vpop.permute.xlu0 %3033  ;;  %3870 = vmatprep.subr.mxu0 %v4210_v20  ;;  %3872 = vmatprep.mubr.msk.f32.mxu0 %vm4211_vm1, %v4210_v20 }
 0x39a   : > { %3858 = vmatmul.mubr.msk.f32.vlgmr.msra.gmra.mxu1 %vm1716_vm2, %v1889_v54  ;;  %3342 = vst.msk [vmem:[%s4781_s16 + $0x60] sm:$0xff] %vm1716_vm2, %v1889_v54  ;;  %3871 = vmatpush3.msra.mxu0 %v3034_v50 }
 0x39b   : > { %v4053_v55 = vpop.eup %4052  ;;  %3866 = vmatpush3.msra.mxu1 %v2958_v51  ;;  %3873 = vmatmul.mubr.msk.f32.vlgmr.msra.gmra.mxu0 %vm1716_vm2, %v1892_v23 }
 0x39c   : > { %3867 = vmatprep.mubr.msk.f32.mxu1 %vm4211_vm1, %v4210_v20  ;;  %v1891_v57 = vmul.f32 %v4053_v55, %v4755_v60  ;;  %3875 = vmatprep.subr.mxu0 %v3112_v52 }
 0x39d   : > { %3876 = vmatpush3.msra.mxu0 %v3112_v52  ;;  %3907 = vmatprep.subr.mxu1 %v3112_v52 }
 0x39e   : > { %3868 = vmatmul.mubr.msk.f32.vlgmr.msra.gmra.mxu1 %vm1716_vm2, %v1891_v57  ;;  %3344 = vst.msk [vmem:[%s4781_s16 + $0x70] sm:$0xff] %vm1716_vm2, %v1891_v57  ;;  %3877 = vmatprep.subr.mxu0 %v3111_v56 }
 0x39f   : > { %3878 = vmatpush3.msra.mxu0 %v3111_v56  ;;  %3911 = vmatpush3.msra.mxu1 %v3112_v52 }
 0x3a0   : > { %3879 = vmatprep.subr.mxu0 %v3110_v9  ;;  %3908 = vmatprep.subr.mxu1 %v3111_v56 }
 0x3a1   : > { %3880 = vmatpush3.msra.mxu0 %v3110_v9  ;;  %3912 = vmatpush3.msra.mxu1 %v3111_v56 }
 0x3a2   : > { %3881 = vmatprep.subr.mxu0 %v3109_v12  ;;  %3909 = vmatprep.subr.mxu1 %v3110_v9 }
 0x3a3   : > { %3882 = vmatpush3.msra.mxu0 %v3109_v12  ;;  %3913 = vmatpush3.msra.mxu1 %v3110_v9 }
 0x3a4   : > { %3910 = vmatprep.subr.mxu1 %v3109_v12 }
 0x3a5   : > { %3914 = vmatpush3.msra.mxu1 %v3109_v12 }
 0x3e9   : > { %v2041_v20 = vpop.f32.mrf.mxu0 }
 0x3eb   : > { %v3804_v59 = vpop.f32.mrf.mxu0 }
 0x3f1   : > { %v2193_v14 = vpop.f32.mrf.mxu0 }
 0x3f3   : > { %v3814_v16 = vpop.f32.mrf.mxu0 }
 0x3f6   : > { %v1965_v60 = vpop.f32.mrf.mxu1 }
 0x3f7   : > { %3883 = vmatprep.mubr.msk.f32.mxu0 %vm350_vm0, %v1965_v60 }
 0x3f8   : > { %v3799_v0 = vpop.f32.mrf.mxu1  ;;  %3884 = vmatmul.mubr.msk.f32.vlgmr.msra.gmra.mxu0 %vm350_vm0, %v2041_v20 }
 0x3fa   : > { %v2117_v1 = vpop.f32.mrf.mxu1 }
 0x3fb   : > { %3886 = vmatprep.mubr.msk.f32.mxu0 %vm350_vm0, %v2117_v1 }
 0x3fc   : > { %v3809_v62 = vpop.f32.mrf.mxu1  ;;  %3887 = vmatmul.mubr.msk.f32.gmra.mxu0 %vm350_vm0, %v2193_v14 }
 0x3fd   : > { %v2345_v32 = vpop.f32.mrf.mxu0 }
 0x3fe   : > { %v2269_v35 = vpop.f32.mrf.mxu1 }
 0x3ff   : > { %v3824_v61 = vpop.f32.mrf.mxu0  ;;  %3889 = vmatprep.mubr.msk.f32.mxu0 %vm350_vm0, %v2269_v35 }
 0x400   : > { %v3819_v4 = vpop.f32.mrf.mxu1  ;;  %3890 = vmatmul.mubr.msk.f32.gmra.mxu0 %vm350_vm0, %v2345_v32 }
 0x402   : > { %v2421_v34 = vpop.f32.mrf.mxu1 }
 0x403   : > { %3892 = vmatprep.mubr.msk.f32.mxu1 %vm350_vm0, %v2421_v34 }
 0x404   : > { %v3829_v37 = vpop.f32.mrf.mxu1 }
 0x40d   : > { %v2497_v6 = vpop.f32.mrf.mxu0 }
 0x40e   : > { %3893 = vmatmul.mubr.msk.f32.vlgmr.msra.gmra.mxu1 %vm350_vm0, %v2497_v6 }
 0x40f   : > { %v3834_v36 = vpop.f32.mrf.mxu0 }
 0x411   : > { %v2649_v7 = vpop.f32.mrf.mxu0 }
 0x413   : > { %v3844_v10 = vpop.f32.mrf.mxu0 }
 0x452   : > { %v2573_v49 = vpop.f32.mrf.mxu1 }
 0x453   : > { %v2801_v13 = vpop.f32.mrf.mxu0  ;;  %3895 = vmatprep.mubr.msk.f32.mxu1 %vm350_vm0, %v2573_v49 }
 0x454   : > { %v3839_v15 = vpop.f32.mrf.mxu1  ;;  %3896 = vmatmul.mubr.msk.f32.gmra.mxu1 %vm350_vm0, %v2649_v7 }
 0x455   : > { %v3854_v5 = vpop.f32.mrf.mxu0 }
 0x456   : > { %v2725_v17 = vpop.f32.mrf.mxu1 }
 0x457   : > { %v2953_v63 = vpop.f32.mrf.mxu0  ;;  %3898 = vmatprep.mubr.msk.f32.mxu1 %vm350_vm0, %v2725_v17 }
 0x458   : > { %v3849_v18 = vpop.f32.mrf.mxu1  ;;  %3899 = vmatmul.mubr.msk.f32.gmra.mxu1 %vm350_vm0, %v2801_v13 }
 0x459   : > { %v3864_v3 = vpop.f32.mrf.mxu0 }
 0x45a   : > { %v2877_v22 = vpop.f32.mrf.mxu1 }
 0x45b   : > { %v3105_v25 = vpop.f32.mrf.mxu0  ;;  %3901 = vmatprep.mubr.msk.f32.mxu1 %vm350_vm0, %v2877_v22 }
 0x45c   : > { %v3859_v26 = vpop.f32.mrf.mxu1  ;;  %3902 = vmatmul.mubr.msk.f32.gmra.mxu1 %vm350_vm0, %v2953_v63 }
 0x45d   : > { %v3874_v58 = vpop.f32.mrf.mxu0 }
 0x45e   : > { %v3029_v2 = vpop.f32.mrf.mxu1 }
 0x45f   : > { %3904 = vmatprep.mubr.msk.f32.mxu1 %vm350_vm0, %v3029_v2 }
 0x460   : > { %v3869_v28 = vpop.f32.mrf.mxu1  ;;  %3905 = vmatmul.mubr.msk.f32.gmra.mxu1 %vm350_vm0, %v3105_v25 }
 0x4b8   : > { %v3885_v30 = vpop.f32.mrf.mxu0 }
 0x4b9   : > { %v3240_v8 = vadd.f32 %v3885_v30, %v3559_v11 }
 0x4ba   : > { %v3234_v31 = vpop.f32.mrf.mxu0 }
 0x4bb   : > { %3315 = vst.msk [vmem:[%s4923_s21 + $0x8] sm:$0xff] %vm3313_vm3, %v3240_v8  ;;  %v3235_v39 = vadd.f32 %v3559_v11, %v3234_v31 }
 0x4bc   : > { %v3888_v19 = vpop.f32.mrf.mxu0 }
 0x4bd   : > { %3314 = vst.msk [vmem:[%s4923_s21] sm:$0xff] %vm3313_vm3, %v3235_v39  ;;  %v3250_v21 = vadd.f32 %v3888_v19, %v3559_v11 }
 0x4be   : > { %v3244_v24 = vpop.f32.mrf.mxu0 }
 0x4bf   : > { %3317 = vst.msk [vmem:[%s4923_s21 + $0x18] sm:$0xff] %vm3313_vm3, %v3250_v21  ;;  %v3245_v23 = vadd.f32 %v3559_v11, %v3244_v24 }
 0x4c0   : > { %v3891_v40 = vpop.f32.mrf.mxu0 }
 0x4c1   : > { %3316 = vst.msk [vmem:[%s4923_s21 + $0x10] sm:$0xff] %vm3313_vm3, %v3245_v23  ;;  %v3260_v42 = vadd.f32 %v3891_v40, %v3559_v11 }
 0x4c2   : > { %v3254_v27 = vpop.f32.mrf.mxu0 }
 0x4c3   : > { %3319 = vst.msk [vmem:[%s4923_s21 + $0x28] sm:$0xff] %vm3313_vm3, %v3260_v42  ;;  %v3255_v29 = vadd.f32 %v3559_v11, %v3254_v27 }
 0x4c5   : > { %3318 = vst.msk [vmem:[%s4923_s21 + $0x20] sm:$0xff] %vm3313_vm3, %v3255_v29 }
 0x4ce   : > { %v3894_v43 = vpop.f32.mrf.mxu1 }
 0x4cf   : > { %v3270_v41 = vadd.f32 %v3894_v43, %v3559_v11 }
 0x4d0   : > { %v3264_v45 = vpop.f32.mrf.mxu1 }
 0x4d1   : > { %3321 = vst.msk [vmem:[%s4923_s21 + $0x38] sm:$0xff] %vm3313_vm3, %v3270_v41  ;;  %v3265_v33 = vadd.f32 %v3559_v11, %v3264_v45 }
 0x4d3   : > { %3320 = vst.msk [vmem:[%s4923_s21 + $0x30] sm:$0xff] %vm3313_vm3, %v3265_v33 }
 0x514   : > { %v3897_v46 = vpop.f32.mrf.mxu1 }
 0x515   : > { %v3280_v48 = vadd.f32 %v3897_v46, %v3559_v11 }
 0x516   : > { %v3274_v38 = vpop.f32.mrf.mxu1 }
 0x517   : > { %3323 = vst.msk [vmem:[%s4923_s21 + $0x48] sm:$0xff] %vm3313_vm3, %v3280_v48  ;;  %v3275_v47 = vadd.f32 %v3559_v11, %v3274_v38 }
 0x518   : > { %v3900_v44 = vpop.f32.mrf.mxu1 }
 0x519   : > { %3322 = vst.msk [vmem:[%s4923_s21 + $0x40] sm:$0xff] %vm3313_vm3, %v3275_v47  ;;  %v3290_v51 = vadd.f32 %v3900_v44, %v3559_v11 }
 0x51a   : > { %v3284_v53 = vpop.f32.mrf.mxu1 }
 0x51b   : > { %3325 = vst.msk [vmem:[%s4923_s21 + $0x58] sm:$0xff] %vm3313_vm3, %v3290_v51  ;;  %v3285_v54 = vadd.f32 %v3559_v11, %v3284_v53 }
 0x51c   : > { %v3903_v50 = vpop.f32.mrf.mxu1 }
 0x51d   : > { %3324 = vst.msk [vmem:[%s4923_s21 + $0x50] sm:$0xff] %vm3313_vm3, %v3285_v54  ;;  %v3300_v52 = vadd.f32 %v3903_v50, %v3559_v11 }
 0x51e   : > { %v3294_v55 = vpop.f32.mrf.mxu1 }
 0x51f   : > { %3327 = vst.msk [vmem:[%s4923_s21 + $0x68] sm:$0xff] %vm3313_vm3, %v3300_v52  ;;  %v3295_v56 = vadd.f32 %v3559_v11, %v3294_v55 }
 0x520   : > { %v3906_v57 = vpop.f32.mrf.mxu1 }
 0x521   : > { %3326 = vst.msk [vmem:[%s4923_s21 + $0x60] sm:$0xff] %vm3313_vm3, %v3295_v56  ;;  %v3310_v9 = vadd.f32 %v3906_v57, %v3559_v11 }
 0x522   : > { %v3304_v12 = vpop.f32.mrf.mxu1 }
 0x523   : > { %3329 = vst.msk [vmem:[%s4923_s21 + $0x78] sm:$0xff] %vm3313_vm3, %v3310_v9  ;;  %v3305_v20 = vadd.f32 %v3559_v11, %v3304_v12 }
 0x525   : > { %3328 = vst.msk [vmem:[%s4923_s21 + $0x70] sm:$0xff] %vm3313_vm3, %v3305_v20 }
 0x526 PF: > { %p19_p5 = scmp.ge.s32.totalorder %s4327_s30, 4   ;;  %s4989_s21 = smov %s4194_s22 }
 0x527   : > { %s4990_s22 = smov %s4198_s23  ;;  %s4991_s23 = smov %s4337_s9 }
 0x528   : > { %s4992_s24 = smov %s4327_s30  ;;  %21 = sbr.rel (!%p19_p5) target bundleno = 5 (0x5), region = 104 }
 0x52d   :  { %3385 = vsyncpa [#allocation3], 1 }
 0x52e   :  { %3387 = vsyncpa [#allocation3 + $0x1], 1 }
 0x52f   :  { %3388 = vsyncpa [#allocation5], 1 }
 0x530   :  { %3389 = vsyncpa [#allocation8], 1 }

</bundles_post_ra>
